<compile_context>
chip_gen: v6e
topology: v6e:2x2x1
jax: 0.10.0
libtpu: 0.0.40
codegen_flags: <defaults>
</compile_context>

<pallas_src>
import math
import functools

import jax
import jax.numpy as jnp
from jax.experimental import pallas as pl
from jax.experimental.pallas import tpu as pltpu


def _round_up(a, m):
    return (a + m - 1) // m * m


def _vmem_budget_bytes():
    """Usable VMEM for this kernel (capacity minus headroom); conservative fallback."""
    try:
        cap = int(pltpu.get_tpu_info().vmem_capacity_bytes)
    except Exception:  # field missing / not queryable -> assume smallest (v7x per-TC, 64 MiB)
        cap = 64 * 1024 * 1024
    return max(16 * 1024 * 1024, cap - 16 * 1024 * 1024)


# ---------------------------------------------------------------------------
# Kernels
# ---------------------------------------------------------------------------

def _rf_kernel_resident(x_ref, w1_ref, bw_ref, o_ref, *, activation):
    """Whole (padded) feature dim in one block; W1/bias/w2 stay VMEM-resident.

    x_ref:  [bb, D]  bf16      w1_ref: [D, Fp] bf16
    bw_ref: [2, Fp]  f32 (row 0 = bias, row 1 = w2)
    o_ref:  [1, bb]  f32 (lane-dense output row)
    """
    h = jnp.dot(x_ref[...], w1_ref[...], preferred_element_type=jnp.float32)  # MXU, [bb, Fp]
    bw = bw_ref[...]
    g = activation(h + bw[0:1, :]) * bw[1:2, :]                               # VPU / EUP
    # Single cross-lane reduce + sublane->lane relayout per batch tile.
    o_ref[...] = jnp.sum(g, axis=-1)[None, :].astype(o_ref.dtype)


def _rf_kernel_tiled(x_ref, w1_ref, bw_ref, o_ref, acc_ref, *, activation):
    """F tiled as a trailing reduction axis; elementwise (VPU-only) accumulation.

    x_ref:  [bb, D]  bf16      w1_ref: [D, bf] bf16
    bw_ref: [2, bf]  f32       o_ref:  [1, bb] f32
    acc_ref:[bb, bf] f32 scratch (persists across the F axis)
    """
    f_idx = pl.program_id(1)

    @pl.when(f_idx == 0)
    def _init():
        acc_ref[...] = jnp.zeros_like(acc_ref)

    h = jnp.dot(x_ref[...], w1_ref[...], preferred_element_type=jnp.float32)  # [bb, bf]
    bw = bw_ref[...]
    # Pure VPU accumulate; no per-step XLU reduce or sublane->lane relayout.
    acc_ref[...] += activation(h + bw[0:1, :]) * bw[1:2, :]

    @pl.when(f_idx == pl.num_programs(1) - 1)
    def _finalize():
        o_ref[...] = jnp.sum(acc_ref[...], axis=-1)[None, :].astype(o_ref.dtype)


# ---------------------------------------------------------------------------
# Wrapper
# ---------------------------------------------------------------------------

@functools.partial(jax.jit, static_argnames=("activation", "block_b", "block_f"))
def random_features_forward(x, w1_t, b1, w2, *, activation=jax.nn.relu,
                            block_b=256, block_f=2048):
    """x:[B,D] f32, w1_t:[D,F], b1:[F], w2:[F]  ->  [B,1] f32."""
    B, D = x.shape
    F = w1_t.shape[1]

    # ---- batch tile: keep it big, but guarantee nb >= 2 when possible so the
    #      "parallel" batch axis can shard across both TensorCores on v7x.
    Bp8 = _round_up(B, 8)
    bb = min(block_b, Bp8)
    if Bp8 > 8:
        bb = min(bb, max(8, _round_up(-(-Bp8 // 2), 8)))
    Bp = _round_up(B, bb)
    nb = Bp // bb

    Fp128 = _round_up(F, 128)
    budget = _vmem_budget_bytes()

    def vmem_need(bf, tiled):
        need = (2 * (D * bf * 2)        # W1 chunk (bf16), double-buffered
                + 2 * (bb * D * 2)      # x tile (bf16), double-buffered
                + 2 * (2 * bf * 4)      # bias/w2 rows, double-buffered
                + 2 * (1 * bb * 4)      # output row
                + 2 * (bb * bf * 4))    # h / elementwise temporaries (estimate)
        if tiled:
            need += bb * bf * 4         # f32 accumulator scratch
        return need

    # ---- feature tiling: keep W1 fully resident if it fits, otherwise stream F chunks.
    resident = (block_f >= Fp128) and (vmem_need(Fp128, tiled=False) <= budget)
    if resident:
        bf = Fp128
    else:
        bf = max(128, (min(block_f, Fp128) // 128) * 128)
        while bf > 128 and vmem_need(bf, tiled=True) > budget:
            bf = max(128, ((bf // 2) // 128) * 128)
        # TODO(synk): for very large D even bf=128 may not fit; additionally tile the K
        # (=D) axis with an h accumulator (K tiles >= 256 on v6e/v7x, 128 on v5e).
    Fp = _round_up(F, bf)
    nf = Fp // bf

    # ---- operand prep: bf16 feed for the MXU (f32 accumulation inside the kernel);
    #      bias and w2 merged into one (2, Fp) f32 operand. Padded features have
    #      b1 = w2 = 0 and a zero W1 column, so they contribute activation(0) * 0 == 0
    #      (assumes activation(0) is finite: true for relu / tanh / gelu / sigmoid ...).
    xb = x.astype(jnp.bfloat16)
    w1b = w1_t.astype(jnp.bfloat16)
    b1f = jnp.asarray(b1, dtype=jnp.float32).reshape(-1)
    w2f = jnp.asarray(w2, dtype=jnp.float32).reshape(-1)
    if Bp != B:
        xb = jnp.pad(xb, ((0, Bp - B), (0, 0)))
    if Fp != F:
        w1b = jnp.pad(w1b, ((0, 0), (0, Fp - F)))
        b1f = jnp.pad(b1f, (0, Fp - F))
        w2f = jnp.pad(w2f, (0, Fp - F))
    bw = jnp.stack([b1f, w2f], axis=0)          # (2, Fp): row 0 = bias, row 1 = w2

    need = vmem_need(bf, tiled=not resident)
    vmem_limit = None
    if need > 12 * 1024 * 1024:                 # stays under every generation's scoped default
        vmem_limit = int(min(budget, need + 8 * 1024 * 1024))

    if resident:
        grid_spec = pltpu.PrefetchScalarGridSpec(
            num_scalar_prefetch=0,
            grid=(nb,),
            in_specs=[
                pl.BlockSpec((bb, D), lambda i: (i, 0)),    # x tile (streamed per step)
                pl.BlockSpec((D, Fp), lambda i: (0, 0)),    # W1 resident (DMA'd once)
                pl.BlockSpec((2, Fp), lambda i: (0, 0)),    # bias/w2 resident
            ],
            out_specs=pl.BlockSpec((None, 1, bb), lambda i: (i, 0, 0)),  # lane-dense rows
        )
        kernel = functools.partial(_rf_kernel_resident, activation=activation)
        dim_sem = ("parallel",)
    else:
        grid_spec = pltpu.PrefetchScalarGridSpec(
            num_scalar_prefetch=0,
            grid=(nb, nf),                                   # F (reduction) axis last
            in_specs=[
                pl.BlockSpec((bb, D), lambda i, f: (i, 0)),  # x tile
                pl.BlockSpec((D, bf), lambda i, f: (0, f)),  # W1 chunk
                pl.BlockSpec((2, bf), lambda i, f: (0, f)),  # bias/w2 chunk
            ],
            out_specs=pl.BlockSpec((None, 1, bb), lambda i, f: (i, 0, 0)),
            scratch_shapes=[pltpu.VMEM((bb, bf), jnp.float32)],
        )
        kernel = functools.partial(_rf_kernel_tiled, activation=activation)
        dim_sem = ("parallel", "arbitrary")

    out_padded = pl.pallas_call(
        kernel,
        out_shape=jax.ShapeDtypeStruct((nb, 1, bb), jnp.float32),
        grid_spec=grid_spec,
        compiler_params=pltpu.CompilerParams(
            dimension_semantics=dim_sem,
            vmem_limit_bytes=vmem_limit,
        ),
    )(xb, w1b, bw)

    # (nb, 1, bb) row-major == batch order; strip padding and restore [B, 1].
    return out_padded.reshape(-1)[:B].reshape(B, 1)


def make_params(key, input_dimension, num_features, small_features=False, epsilon=None):
    """Mirror the PyTorch init: W1, b1 ~ N(0, std); W2 filled with 0.0."""
    std = epsilon if small_features else 1.0 / math.sqrt(input_dimension)
    k_w, k_b = jax.random.split(key)
    w1 = std * jax.random.normal(k_w, (num_features, input_dimension), dtype=jnp.float32)
    b1 = std * jax.random.normal(k_b, (num_features,), dtype=jnp.float32)
    w2 = jnp.zeros((num_features,), dtype=jnp.float32)   # nn.Linear(F,1,bias=False).fill_(0)
    return w1.T, b1, w2   # pre-transposed W1 for the kernel


def _reference(x, w1_t, b1, w2, activation):
    # Plain-JAX reference using the same bf16-cast operands as the kernel's MXU path.
    x32 = x.astype(jnp.bfloat16).astype(jnp.float32)
    w132 = w1_t.astype(jnp.bfloat16).astype(jnp.float32)
    h = jnp.dot(x32, w132, preferred_element_type=jnp.float32) + b1[None, :]
    return (activation(h) * w2[None, :]).sum(axis=-1, keepdims=True)


if __name__ == "__main__":
    key = jax.random.PRNGKey(0)

    # Small deterministic configs: (B, D, F, block_f).
    #   cfg 0: resident-W1 fast path, non-multiple-of-8 batch (exercises padding)
    #   cfg 1: small block_f forces the tiled (F-reduction) path, nf = 2
    #   cfg 2: slightly larger, still resident path, nb = 2 batch tiles
    configs = [
        (13, 32, 256, 2048),
        (16, 32, 256, 128),
        (64, 128, 512, 2048),
    ]
    for idx, (B, D, F, block_f) in enumerate(configs):
        k_x, k_p, k_w2, key = jax.random.split(key, 4)
        x = jax.random.normal(k_x, (B, D), dtype=jnp.float32)
        w1_t, b1, w2 = make_params(k_p, input_dimension=D, num_features=F)
        # PyTorch fills W2 with 0.0 (as make_params does); use a nonzero W2 here so the
        # numerical check is meaningful (zeros-vs-zeros would pass trivially).
        w2 = jax.random.normal(k_w2, (F,), dtype=jnp.float32) / math.sqrt(F)

        out = random_features_forward(x, w1_t, b1, w2, activation=jax.nn.relu,
                                      block_b=256, block_f=block_f)
        out = jax.block_until_ready(out)
        ref = _reference(x, w1_t, b1, w2, jax.nn.relu)

        assert out.shape == (B, 1), (idx, out.shape)
        max_err = float(jnp.max(jnp.abs(out - ref)))
        assert jnp.allclose(out, ref, atol=5e-2, rtol=5e-2), (
            f"config {idx}: mismatch vs reference (max err {max_err})")

    print("KERNEL_OK")
</pallas_src>

<mosaic_0001>
module attributes {stable_mosaic.version = 11 : i64} {
  func.func @_rf_kernel_resident(%arg0: i32, %arg1: memref<8x32xbf16, #tpu.memory_space<vmem>>, %arg2: memref<32x256xbf16, #tpu.memory_space<vmem>>, %arg3: memref<2x256xf32, #tpu.memory_space<vmem>>, %arg4: memref<1x1x8xf32, #tpu.memory_space<vmem>>) attributes {dimension_semantics = [#tpu.dimension_semantics<parallel>], iteration_bounds = array<i64: 2>, scalar_prefetch = 0 : i64, scratch_operands = 0 : i64, tpu.core_type = #tpu.core_type<tc>, window_params = [{transform_indices = @transform_0, window_bounds = array<i64: 8, 32>}, {pipeline_mode = #tpu.pipeline_mode<synchronous>, transform_indices = @transform_1, window_bounds = array<i64: 32, 256>}, {pipeline_mode = #tpu.pipeline_mode<synchronous>, transform_indices = @transform_2, window_bounds = array<i64: 2, 256>}, {transform_indices = @transform_3, window_bounds = array<i64: 1, 1, 8>}]} {
    %c0 = arith.constant 0 : index
    %c0_0 = arith.constant 0 : index
    %0 = vector.load %arg1[%c0, %c0_0] : memref<8x32xbf16, #tpu.memory_space<vmem>>, vector<8x32xbf16>
    %c0_1 = arith.constant 0 : index
    %c0_2 = arith.constant 0 : index
    %1 = vector.load %arg2[%c0_1, %c0_2] : memref<32x256xbf16, #tpu.memory_space<vmem>>, vector<32x256xbf16>
    %cst = arith.constant dense<0.000000e+00> : vector<8x256xf32>
    %2 = tpu.matmul %0, %1, %cst {dimension_numbers = #tpu.dot_dimension_numbers<[1], [0], [0], [1], [0, 0, 1, 1], [], []>} : vector<8x32xbf16>, vector<32x256xbf16>, vector<8x256xf32> -> vector<8x256xf32>
    %c0_3 = arith.constant 0 : index
    %c0_4 = arith.constant 0 : index
    %3 = vector.load %arg3[%c0_3, %c0_4] : memref<2x256xf32, #tpu.memory_space<vmem>>, vector<2x256xf32>
    %4 = vector.extract_strided_slice %3 {offsets = [0, 0], sizes = [1, 256], strides = [1, 1]} : vector<2x256xf32> to vector<1x256xf32>
    %5 = vector.broadcast %4 : vector<1x256xf32> to vector<8x256xf32>
    %6 = arith.addf %2, %5 : vector<8x256xf32>
    %cst_5 = arith.constant 0.000000e+00 : f32
    %7 = vector.broadcast %cst_5 : f32 to vector<8x256xf32>
    %8 = arith.maximumf %6, %7 : vector<8x256xf32>
    %9 = vector.extract_strided_slice %3 {offsets = [1, 0], sizes = [1, 256], strides = [1, 1]} : vector<2x256xf32> to vector<1x256xf32>
    %10 = vector.broadcast %9 : vector<1x256xf32> to vector<8x256xf32>
    %11 = arith.mulf %8, %10 : vector<8x256xf32>
    %cst_6 = arith.constant dense<0.000000e+00> : vector<8xf32>
    %12 = vector.multi_reduction <add>, %11, %cst_6 [1] : vector<8x256xf32> to vector<8xf32>
    %13 = vector.shape_cast %12 : vector<8xf32> to vector<1x8xf32>
    %c0_7 = arith.constant 0 : index
    %c0_8 = arith.constant 0 : index
    %c0_9 = arith.constant 0 : index
    %14 = vector.load %arg4[%c0_7, %c0_8, %c0_9] : memref<1x1x8xf32, #tpu.memory_space<vmem>>, vector<1x1x8xf32>
    %15 = vector.shape_cast %14 : vector<1x1x8xf32> to vector<1x8xf32>
    %16 = vector.shape_cast %13 : vector<1x8xf32> to vector<1x1x8xf32>
    tpu.vector_store %arg4[%c0_7, %c0_8, %c0_9], %16 {strides = array<i32>} : memref<1x1x8xf32, #tpu.memory_space<vmem>>, vector<1x1x8xf32>,
    return
  }
  func.func @transform_0(%arg0: i32) -> (i32, i32) {
    %c0_i32 = arith.constant 0 : i32
    %c0_i32_0 = arith.constant 0 : i32
    return %arg0, %c0_i32 : i32, i32
  }
  func.func @transform_1(%arg0: i32) -> (i32, i32) {
    %c0_i32 = arith.constant 0 : i32
    %c0_i32_0 = arith.constant 0 : i32
    %c0_i32_1 = arith.constant 0 : i32
    return %c0_i32, %c0_i32_0 : i32, i32
  }
  func.func @transform_2(%arg0: i32) -> (i32, i32) {
    %c0_i32 = arith.constant 0 : i32
    %c0_i32_0 = arith.constant 0 : i32
    %c0_i32_1 = arith.constant 0 : i32
    return %c0_i32, %c0_i32_0 : i32, i32
  }
  func.func @transform_3(%arg0: i32) -> (i32, i32, i32) {
    %c0_i32 = arith.constant 0 : i32
    %c0_i32_0 = arith.constant 0 : i32
    %c0_i32_1 = arith.constant 0 : i32
    return %arg0, %c0_i32, %c0_i32_0 : i32, i32, i32
  }
}

</mosaic_0001>

<bundles_post_ra>
// kernel: random_features_forward.1
= control target key start
LH: loop header
LB: loop body
LE: loop exit
PB: predicated region body
PF: predicated region fallthrough
CT: control target
= control target key end

     0   :  { %s394_s12 = smov 0   ;;  %s430_s0 = inlined_call_operand.vmem [shape: bf16[16,32], index: 0, kind: input, shape index: {}]   ;;  %s431_s1 = inlined_call_operand.vmem [shape: bf16[32,256], index: 1, kind: input, shape index: {}]   ;;  %s432_s2 = inlined_call_operand.vmem [shape: f32[2,256], index: 2, kind: input, shape index: {}]   ;;  %s433_s3 = inlined_call_operand.vmem [shape: f32[2,1,8], index: 3, kind: output, shape index: {}]  }
   0x1 LB: > { %s337_s13 = sadd.s32 4294967295, %s371_s12   ;;  %p341_p0 = scmp.ge.s32.totalorder %s371_s12, 1  ;;  %s371_s12 = sphi %s394_s12, %s13_s12  }
   0x2   : > { %p136_p1 = scmp.lt.s32.totalorder %s371_s12, 3 }
   0x4   : > { %p137_p2 = pnand %p341_p0, %p136_p1 }
   0x5   : > { %p157_p3 = scmp.lt.s32.totalorder (!%p137_p2), %s337_s13, 1 }
   0x6   : > { %140 = sbr.rel (%p137_p2) target bundleno = 364 (0x16c), region = 32 }
   0xb   : > { %v359_v0 = vld [vmem:[%s431_s1 + $0x14] ss:$8 sps:$4 sm:$0xff]   ;;  %v361_v1 = vld [vmem:[%s431_s1 + $0x10] ss:$8 sps:$4 sm:$0xff]   ;;  %v373_v2 = vmov 0   ;;  %s435_s13 = smov (!%p157_p3, %s337_s13), 1  ;;  %v172_v6 = vlaneseq }
   0xc   : > { %246 = vmatprep.mubr.bf16.mxu0 %v373_v2  ;;  %226 = vmatprep.subr.bf16.mxu0 %v359_v0  ;;  %v362_v3 = vld [vmem:[%s431_s1 + $0x4] ss:$8 sps:$4 sm:$0xff]   ;;  %v364_v4 = vld [vmem:[%s431_s1] ss:$8 sps:$4 sm:$0xff]   ;;  %s342_s22 = sshll.u32 %s435_s13, 2  ;;  %vm210_vm0 = vcmask 261120   ;;  %s163_s30 = scalar_lea.vmem %s433_s3, %s435_s13 }
   0xd   : > { %227 = vmatpush1.bf16.msra.mxu0 %v361_v1  ;;  %s160_s25 = scalar_lea.vmem %s430_s0, %s342_s22  ;;  %v173_v7 = vshrl.u32 %v172_v6, 7  ;;  %v170_v9 = vld [vmem:[%s432_s2] sm:$0xf]  ;;  %v282_v32 = vand.u32 127, %v172_v6  ;;  %vm288_vm1 = vcmask 57344  }
   0xe   : > { %228 = vmatprep.subr.bf16.mxu0 %v362_v3  ;;  %v165_v5 = vld [vmem:[%s160_s25] sm:$0xf] }
   0xf   : > { %v174_v8 = vsub.s32 0, %v173_v7  ;;  %v178_v10 = vsub.s32 2, %v173_v7  ;;  %v259_v13 = vsub.s32 1, %v173_v7  ;;  %v263_v14 = vsub.s32 3, %v173_v7 }
  0x10   : > { %v285_v33 = vsub.s32 %v282_v32, %v173_v7 }
  0x11   : > { %229 = vmatpush1.bf16.msra.mxu0 %v364_v4  ;;  %v175_v11 = vrot.slane %v170_v9, %v174_v8  ;;  %v179_v12 = vrot.slane %v170_v9, %v178_v10  ;;  %v260_v17 = vrot.slane %v170_v9, %v259_v13  ;;  %v264_v18 = vrot.slane %v170_v9, %v263_v14 }
  0x13   : > { %v185_v15 = vrot.slane %v175_v11, %v174_v8  ;;  %v189_v16 = vrot.slane %v179_v12, %v174_v8  ;;  %v270_v24 = vrot.slane %v260_v17, %v259_v13  ;;  %v274_v25 = vrot.slane %v264_v18, %v259_v13 }
  0x14   : > { %347 = vmatmul.mubr.msk.bf16.vlgmr.msra.gmra.mxu0 %vm210_vm0, %v165_v5 }
  0xd4   : > { %v248_v19 = vpop.f32.mrf.mxu0 }
  0xd5   : > { %v249_v20 = vadd.f32 %v248_v19, %v185_v15 }
  0xd6   : > { %v250_v21 = vpop.f32.mrf.mxu0 }
  0xd7   : > { %v255_v22 = vmax.f32 %v249_v20, 0.0  ;;  %v251_v23 = vadd.f32 %v250_v21, %v189_v16 }
  0xd8   : > { %v252_v26 = vpop.f32.mrf.mxu0 }
  0xd9   : > { %v256_v27 = vmax.f32 %v251_v23, 0.0  ;;  %v275_v29 = vmul.f32 %v270_v24, %v255_v22 }
  0xda   : > { %v253_v28 = vpop.f32.mrf.mxu0 }
  0xdb   : > { %v276_v30 = vmul.f32 %v274_v25, %v256_v27 }
  0xdd   : > { %v277_v31 = vadd.f32 %v276_v30, %v275_v29 }
  0xdf   : > { %278 = vadd.xlane.f32.xlu0 %v277_v31 }
 0x168   : > { %v279_v34 = vpop.xlane.xlu0 %278 }
 0x169   : > { %v286_v35 = vrot.slane %v279_v34, %v285_v33 }
 0x16b   : > { %289 = vst.msk [vmem:[%s163_s30] sm:$0x1] %vm288_vm1, %v286_v35 }
 0x16c PF: > { %s13_s12 = sadd.s32 1, %s371_s12  }
 0x16d   : > { %p10_p4 = scmp.ge.s32.totalorder %s13_s12, 4  }
 0x16f   :  { %12 = sbr.rel (!%p10_p4) target bundleno = 1 (0x1), region = 62 }

</bundles_post_ra>
